<compile_context>
chip_gen: v6e
topology: v6e:2x2x1
jax: 0.10.0
libtpu: 0.0.40
codegen_flags: <defaults>
</compile_context>

<pallas_src>
import jax
import jax.numpy as jnp
from jax.experimental import pallas as pl
from jax.experimental.pallas import tpu as pltpu


def conv2d_pallas(x_nchw, w_oihw, bias):
    """Valid (padding=0), stride-1 2D conv. x_nchw: [N,C,H,W], w_oihw: [Cout,Cin,KH,KW]."""
    N, C, H, W = x_nchw.shape
    COUT, CIN, KH, KW = w_oihw.shape
    assert C == CIN
    HO, WO = H - KH + 1, W - KW + 1
    HW = H * W                       # per-image lane width on the padded output grid (256)
    NHW = N * HW                     # fused lane width for the whole batch (512)
    K = CIN * KH * KW                # contraction length (27)

    # ---- wrapper-side layout plumbing only (no compute, no im2col) --------------------
    x_flat = x_nchw.reshape(N, CIN, HW)                          # free reshape of NCHW
    # Contraction index order (kh, kw, cin) to match the in-kernel tap assembly below.
    w2d = jnp.transpose(w_oihw, (0, 2, 3, 1)).reshape(COUT, K)   # [COUT, KH*KW*CIN], tiny
    b2d = bias.reshape(COUT, 1)                                  # [COUT, 1]

    taps = [(kh, kw) for kh in range(KH) for kw in range(KW)]    # static tap list

    # ---- Pallas kernel: in-kernel im2col via lane rolls + one MXU matmul --------------
    def kernel(x_ref, w_ref, b_ref, o_ref):
        # x_ref: [N, CIN, HW]; w_ref: [COUT, K]; b_ref: [COUT, 1]; o_ref: [N, COUT, HW]
        # Lane-concat the N images -> [CIN, N*HW].  Offsets are multiples of 256 (aligned).
        xcat = jnp.concatenate([x_ref[n] for n in range(N)], axis=-1)

        # Build the 27-row contraction operand: tap (kh, kw) needs value x[p + kh*W + kw]
        # at output position p, i.e. a left-roll by (kh*W + kw) of the flattened row.
        # roll(x, NHW - off) == jnp.roll(x, -off):  result[p] = x[(p + off) mod NHW].
        # The mod-wrap (and cross-image bleed) only hits positions with ho >= HO or
        # wo >= WO, which the wrapper slices away.
        rows = []
        for kh, kw in taps:
            off = kh * W + kw
            rows.append(xcat if off == 0
                        else pltpu.roll(xcat, (NHW - off) % NHW, axis=1))
        patches = jnp.concatenate(rows, axis=0)                  # [K, N*HW] (kh, kw, cin)

        # One MXU matmul for the whole batch; bias broadcast exactly once.
        acc = jnp.dot(w_ref[...], patches, preferred_element_type=jnp.float32)
        acc = acc + b_ref[...]                                   # [COUT, N*HW]

        # Split the fused lane axis back per image (offsets are 128-aligned),
        # lane-dense 256-wide stores, output already NCHW-ordered.
        for n in range(N):
            o_ref[n] = acc[:, n * HW:(n + 1) * HW].astype(o_ref.dtype)

    out = pl.pallas_call(
        kernel,
        out_shape=jax.ShapeDtypeStruct((N, COUT, HW), x_nchw.dtype),
        in_specs=[pl.BlockSpec(memory_space=pltpu.MemorySpace.VMEM)] * 3,
        out_specs=pl.BlockSpec(memory_space=pltpu.MemorySpace.VMEM),
    )(x_flat, w2d, b2d)

    # Free reshape, then keep only the valid HOxWO window of the padded output grid.
    return out.reshape(N, COUT, H, W)[:, :, :HO, :WO]


if __name__ == "__main__":
    key = jax.random.PRNGKey(0)
    k_x, k_w, k_b = jax.random.split(key, 3)

    N, CIN, H, W = 2, 3, 16, 16
    COUT, KH, KW = 6, 3, 3

    x = jax.random.normal(k_x, (N, CIN, H, W), dtype=jnp.float32)
    # Deterministic synthetic parameters (PyTorch-style uniform fan-in scaling).
    fan_in = CIN * KH * KW
    bound = 1.0 / (fan_in ** 0.5)
    weight = jax.random.uniform(k_w, (COUT, CIN, KH, KW), jnp.float32, -bound, bound)
    bias = jax.random.uniform(k_b, (COUT,), jnp.float32, -bound, bound)

    conv = jax.jit(conv2d_pallas)
    out = jax.block_until_ready(conv(x, weight, bias))

    # Reference check with XLA's conv (NCHW / OIHW, valid padding, stride 1).
    ref = jax.lax.conv_general_dilated(
        x, weight, window_strides=(1, 1), padding="VALID",
        dimension_numbers=("NCHW", "OIHW", "NCHW"),
    ) + bias.reshape(1, COUT, 1, 1)
    ref = jax.block_until_ready(ref)

    assert out.shape == (N, COUT, H - KH + 1, W - KW + 1)
    assert jnp.allclose(out, ref, atol=1e-4, rtol=1e-4), "mismatch vs reference conv"
    print("KERNEL_OK")
</pallas_src>

<mosaic_0001>
module attributes {stable_mosaic.version = 11 : i64} {
  func.func @kernel(%arg0: memref<2x3x256xf32, #tpu.memory_space<vmem>>, %arg1: memref<6x27xf32, #tpu.memory_space<vmem>>, %arg2: memref<6x1xf32, #tpu.memory_space<vmem>>, %arg3: memref<2x6x256xf32, #tpu.memory_space<vmem>>) attributes {dimension_semantics = [], scalar_prefetch = 0 : i64, scratch_operands = 0 : i64, tpu.core_type = #tpu.core_type<tc>} {
    %c0 = arith.constant 0 : index
    %c0_0 = arith.constant 0 : index
    %c0_1 = arith.constant 0 : index
    %0 = vector.load %arg0[%c0, %c0_0, %c0_1] : memref<2x3x256xf32, #tpu.memory_space<vmem>>, vector<1x3x256xf32>
    %1 = vector.shape_cast %0 : vector<1x3x256xf32> to vector<3x256xf32>
    %c1 = arith.constant 1 : index
    %c0_2 = arith.constant 0 : index
    %c0_3 = arith.constant 0 : index
    %2 = vector.load %arg0[%c1, %c0_2, %c0_3] : memref<2x3x256xf32, #tpu.memory_space<vmem>>, vector<1x3x256xf32>
    %3 = vector.shape_cast %2 : vector<1x3x256xf32> to vector<3x256xf32>
    %4 = tpu.concatenate %1, %3 in 1 : vector<3x256xf32>, vector<3x256xf32> -> vector<3x512xf32>
    %c511_i32 = arith.constant 511 : i32
    %5 = tpu.dynamic_rotate %4 by %c511_i32 dim 1 : vector<3x512xf32>, i32 -> vector<3x512xf32>
    %c510_i32 = arith.constant 510 : i32
    %6 = tpu.dynamic_rotate %4 by %c510_i32 dim 1 : vector<3x512xf32>, i32 -> vector<3x512xf32>
    %c496_i32 = arith.constant 496 : i32
    %7 = tpu.dynamic_rotate %4 by %c496_i32 dim 1 : vector<3x512xf32>, i32 -> vector<3x512xf32>
    %c495_i32 = arith.constant 495 : i32
    %8 = tpu.dynamic_rotate %4 by %c495_i32 dim 1 : vector<3x512xf32>, i32 -> vector<3x512xf32>
    %c494_i32 = arith.constant 494 : i32
    %9 = tpu.dynamic_rotate %4 by %c494_i32 dim 1 : vector<3x512xf32>, i32 -> vector<3x512xf32>
    %c480_i32 = arith.constant 480 : i32
    %10 = tpu.dynamic_rotate %4 by %c480_i32 dim 1 : vector<3x512xf32>, i32 -> vector<3x512xf32>
    %c479_i32 = arith.constant 479 : i32
    %11 = tpu.dynamic_rotate %4 by %c479_i32 dim 1 : vector<3x512xf32>, i32 -> vector<3x512xf32>
    %c478_i32 = arith.constant 478 : i32
    %12 = tpu.dynamic_rotate %4 by %c478_i32 dim 1 : vector<3x512xf32>, i32 -> vector<3x512xf32>
    %13 = tpu.concatenate %4, %5, %6, %7, %8, %9, %10, %11, %12 in 0 : vector<3x512xf32>, vector<3x512xf32>, vector<3x512xf32>, vector<3x512xf32>, vector<3x512xf32>, vector<3x512xf32>, vector<3x512xf32>, vector<3x512xf32>, vector<3x512xf32> -> vector<27x512xf32>
    %c0_4 = arith.constant 0 : index
    %c0_5 = arith.constant 0 : index
    %14 = vector.load %arg1[%c0_4, %c0_5] : memref<6x27xf32, #tpu.memory_space<vmem>>, vector<6x27xf32>
    %cst = arith.constant dense<0.000000e+00> : vector<6x512xf32>
    %15 = tpu.matmul %14, %13, %cst {dimension_numbers = #tpu.dot_dimension_numbers<[1], [0], [0], [1], [0, 0, 1, 1], [], []>} : vector<6x27xf32>, vector<27x512xf32>, vector<6x512xf32> -> vector<6x512xf32>
    %c0_6 = arith.constant 0 : index
    %c0_7 = arith.constant 0 : index
    %16 = vector.load %arg2[%c0_6, %c0_7] : memref<6x1xf32, #tpu.memory_space<vmem>>, vector<6x1xf32>
    %17 = vector.broadcast %16 : vector<6x1xf32> to vector<6x512xf32>
    %18 = arith.addf %15, %17 : vector<6x512xf32>
    %19 = vector.extract_strided_slice %18 {offsets = [0, 0], sizes = [6, 256], strides = [1, 1]} : vector<6x512xf32> to vector<6x256xf32>
    %c0_8 = arith.constant 0 : index
    %c0_9 = arith.constant 0 : index
    %c0_10 = arith.constant 0 : index
    %20 = vector.load %arg3[%c0_8, %c0_9, %c0_10] : memref<2x6x256xf32, #tpu.memory_space<vmem>>, vector<1x6x256xf32>
    %21 = vector.shape_cast %20 : vector<1x6x256xf32> to vector<6x256xf32>
    %22 = vector.shape_cast %19 : vector<6x256xf32> to vector<1x6x256xf32>
    tpu.vector_store %arg3[%c0_8, %c0_9, %c0_10], %22 {strides = array<i32>} : memref<2x6x256xf32, #tpu.memory_space<vmem>>, vector<1x6x256xf32>,
    %23 = vector.extract_strided_slice %18 {offsets = [0, 256], sizes = [6, 256], strides = [1, 1]} : vector<6x512xf32> to vector<6x256xf32>
    %c1_11 = arith.constant 1 : index
    %c0_12 = arith.constant 0 : index
    %c0_13 = arith.constant 0 : index
    %24 = vector.load %arg3[%c1_11, %c0_12, %c0_13] : memref<2x6x256xf32, #tpu.memory_space<vmem>>, vector<1x6x256xf32>
    %25 = vector.shape_cast %24 : vector<1x6x256xf32> to vector<6x256xf32>
    %26 = vector.shape_cast %23 : vector<6x256xf32> to vector<1x6x256xf32>
    tpu.vector_store %arg3[%c1_11, %c0_12, %c0_13], %26 {strides = array<i32>} : memref<2x6x256xf32, #tpu.memory_space<vmem>>, vector<1x6x256xf32>,
    return
  }
}

</mosaic_0001>

<bundles_post_ra>
// kernel: conv2d_pallas.1
= control target key start
LH: loop header
LB: loop body
LE: loop exit
PB: predicated region body
PF: predicated region fallthrough
CT: control target
= control target key end

     0   :  { %s444_s16 = smov 110   ;;  %s445_s17 = smov 96   ;;  %v451_v4 = vmov 0.0   ;;  %v452_v5 = vmov 0   ;;  %v31_v21 = vlaneseq  ;;  %vm238_vm2 = vcmask 1041408   ;;  %s699_s0 = inlined_call_operand.vmem [shape: f32[2,3,256], index: 0, kind: input, shape index: {}]   ;;  %s700_s2 = inlined_call_operand.vmem [shape: f32[6,1], index: 2, kind: input, shape index: {}]   ;;  %s701_s1 = inlined_call_operand.vmem [shape: f32[6,27], index: 1, kind: input, shape index: {}]   ;;  %s702_s3 = inlined_call_operand.vmem [shape: f32[2,6,256], index: 3, kind: output, shape index: {}]  }
   0x1   :  { %v477_v0 = vld [vmem:[%s699_s0 + $0x8] sm:$0x77]  ;;  %v482_v1 = vld [vmem:[%s699_s0] sm:$0x77]  ;;  %s446_s0 = smov 126   ;;  %s447_s18 = smov 112   ;;  %335 = vmatprep.mubr.f32.mxu0 %v451_v4  ;;  %406 = vmatprep.mubr.f32.mxu1 %v451_v4 }
   0x2   :  { %81 = vrot.lane.b32.xlu1 %v477_v0, %s444_s16  ;;  %77 = vrot.lane.b32.xlu0 %v482_v1, %s444_s16  ;;  %v488_v2 = vcombine.high %v477_v0, %v477_v0  ;;  %v492_v3 = vcombine.high %v482_v1, %v482_v1  ;;  %s448_s19 = smov 95   ;;  %s449_s20 = smov 111   ;;  %v249_v6 = vld [vmem:[%s700_s2] sm:$0x3f]  ;;  %v527_v24 = vand.u32 127, %v31_v21  ;;  %vm223_vm6 = vcmask 1040384  }
   0x3   :  { %s450_s21 = smov 94   ;;  %441 = vset.pattern.permute.xlu0 %v452_v5  ;;  %s453_s22 = smov 127   ;;  %vm213_vm9 = vcmask 1042432   ;;  %vm243_vm10 = vcmask 1044480   ;;  %vm228_vm11 = vcmask 1043456   ;;  %vm233_vm13 = vcmask 1046528  }
   0x4   :  { %vm98_vm0 = vcmp.lt.s32.totalorder %v527_v24, 96  ;;  %vm85_vm1 = vcmp.lt.s32.totalorder %v527_v24, 110  ;;  %vm46_vm3 = vcmp.lt.s32.totalorder %v527_v24, 126  ;;  %vm59_vm4 = vcmp.lt.s32.totalorder %v527_v24, 112 }
   0x5   :  { %vm111_vm5 = vcmp.lt.s32.totalorder %v527_v24, 95  ;;  %vm72_vm7 = vcmp.lt.s32.totalorder %v527_v24, 111  ;;  %vm124_vm8 = vcmp.lt.s32.totalorder %v527_v24, 94  ;;  %vm33_vm12 = vcmp.lt.s32.totalorder %v527_v24, 127 }
   0x6   :  { %83 = vrot.lane.b32.xlu1 %v488_v2, %s444_s16  ;;  %79 = vrot.lane.b32.xlu0 %v492_v3, %s444_s16  ;;  %vm218_vm14 = vcmask 1045504   ;;  %vm255_vm15 = vcmask 220160  }
   0xa   :  { %92 = vrot.lane.b32.xlu1 %v492_v3, %s445_s17  ;;  %90 = vrot.lane.b32.xlu0 %v482_v1, %s445_s17 }
   0xe   :  { %96 = vrot.lane.b32.xlu1 %v488_v2, %s445_s17  ;;  %94 = vrot.lane.b32.xlu0 %v477_v0, %s445_s17 }
  0x12   :  { %40 = vrot.lane.b32.xlu1 %v492_v3, %s446_s0  ;;  %38 = vrot.lane.b32.xlu0 %v482_v1, %s446_s0 }
  0x16   :  { %44 = vrot.lane.b32.xlu1 %v488_v2, %s446_s0  ;;  %42 = vrot.lane.b32.xlu0 %v477_v0, %s446_s0 }
  0x1a   :  { %53 = vrot.lane.b32.xlu1 %v492_v3, %s447_s18  ;;  %51 = vrot.lane.b32.xlu0 %v482_v1, %s447_s18 }
  0x1e   :  { %57 = vrot.lane.b32.xlu1 %v488_v2, %s447_s18  ;;  %55 = vrot.lane.b32.xlu0 %v477_v0, %s447_s18 }
  0x22   :  { %105 = vrot.lane.b32.xlu1 %v492_v3, %s448_s19  ;;  %103 = vrot.lane.b32.xlu0 %v482_v1, %s448_s19 }
  0x26   :  { %109 = vrot.lane.b32.xlu1 %v488_v2, %s448_s19  ;;  %107 = vrot.lane.b32.xlu0 %v477_v0, %s448_s19 }
  0x2a   :  { %66 = vrot.lane.b32.xlu1 %v492_v3, %s449_s20  ;;  %64 = vrot.lane.b32.xlu0 %v482_v1, %s449_s20 }
  0x2e   :  { %70 = vrot.lane.b32.xlu1 %v488_v2, %s449_s20  ;;  %68 = vrot.lane.b32.xlu0 %v477_v0, %s449_s20 }
  0x32   :  { %118 = vrot.lane.b32.xlu1 %v492_v3, %s450_s21  ;;  %116 = vrot.lane.b32.xlu0 %v482_v1, %s450_s21 }
  0x36   :  { %122 = vrot.lane.b32.xlu1 %v488_v2, %s450_s21  ;;  %120 = vrot.lane.b32.xlu0 %v477_v0, %s450_s21 }
  0x3a   :  { %25 = vrot.lane.b32.xlu1 %v492_v3, %s453_s22  ;;  %23 = vrot.lane.b32.xlu0 %v482_v1, %s453_s22 }
  0x3e   :  { %29 = vrot.lane.b32.xlu1 %v488_v2, %s453_s22  ;;  %27 = vrot.lane.b32.xlu0 %v477_v0, %s453_s22 }
  0x42   :  { %252 = vperm.xlu0 %441, %v249_v6  }
  0x74   :  { %v82_v7 = vpop.permute.xlu1 %81  ;;  %v78_v8 = vpop.permute.xlu0 %77 }
  0x78   :  { %v84_v9 = vpop.permute.xlu1 %83  ;;  %v80_v10 = vpop.permute.xlu0 %79 }
  0x79   :  { %v535_v32 = vsel %vm85_vm1, %v78_v8, %v80_v10  ;;  %v537_v34 = vsel %vm85_vm1, %v84_v9, %v78_v8  ;;  %v539_v35 = vsel %vm85_vm1, %v80_v10, %v82_v7  ;;  %v542_v37 = vsel %vm85_vm1, %v82_v7, %v84_v9 }
  0x7a   :  { %v181_v42 = vrot.slane %v535_v32, 1  ;;  %v184_v44 = vrot.slane %v537_v34, 1  ;;  %v182_v45 = vrot.slane %v539_v35, 1  ;;  %v183_v47 = vrot.slane %v542_v37, 1 }
  0x7c   :  { %v93_v11 = vpop.permute.xlu1 %92  ;;  %v91_v12 = vpop.permute.xlu0 %90 }
  0x7d   :  { %v101_v27 = vsel %vm98_vm0, %v91_v12, %v93_v11 }
  0x7e   :  { %v193_v36 = vrot.slane %v101_v27, 6 }
  0x80   :  { %v97_v13 = vpop.permute.xlu1 %96  ;;  %v95_v14 = vpop.permute.xlu0 %94  ;;  %v565_v50 = vsel %vm238_vm2, %v181_v42, %v193_v36 }
  0x81   :  { %v102_v30 = vsel %vm98_vm0, %v97_v13, %v91_v12  ;;  %v100_v31 = vsel %vm98_vm0, %v93_v11, %v95_v14  ;;  %v99_v33 = vsel %vm98_vm0, %v95_v14, %v97_v13 }
  0x82   :  { %v196_v38 = vrot.slane %v102_v30, 6  ;;  %v194_v39 = vrot.slane %v100_v31, 6  ;;  %v195_v43 = vrot.slane %v99_v33, 6 }
  0x84   :  { %v41_v15 = vpop.permute.xlu1 %40  ;;  %v39_v16 = vpop.permute.xlu0 %38  ;;  %v240_v55 = vsel %vm238_vm2, %v182_v45, %v194_v39  ;;  %v242_v56 = vsel %vm238_vm2, %v184_v44, %v196_v38  ;;  %v241_v60 = vsel %vm238_vm2, %v183_v47, %v195_v43 }
  0x85   :  { %v551_v46 = vsel %vm46_vm3, %v39_v16, %v41_v15 }
  0x86   :  { %v145_v57 = vrot.slane %v551_v46, 2 }
  0x88   :  { %v45_v17 = vpop.permute.xlu1 %44  ;;  %v43_v18 = vpop.permute.xlu0 %42 }
  0x89   :  { %v557_v48 = vsel %vm46_vm3, %v45_v17, %v39_v16  ;;  %v580_v58 = vsel %vm46_vm3, %v43_v18, %v45_v17  ;;  %v590_v62 = vsel %vm46_vm3, %v41_v15, %v43_v18 }
  0x8a   :  { %v148_v61 = vrot.slane %v557_v48, 2  ;;  %v146_v15 = vrot.slane %v590_v62, 2 }
  0x8c   :  { %v54_v19 = vpop.permute.xlu1 %53  ;;  %v52_v20 = vpop.permute.xlu0 %51 }
  0x8d   :  { %v62_v49 = vsel %vm59_vm4, %v52_v20, %v54_v19 }
  0x8e   :  { %v157_v63 = vrot.slane %v62_v49, 7 }
  0x90   :  { %v58_v22 = vpop.permute.xlu1 %57  ;;  %v56_v23 = vpop.permute.xlu0 %55 }
  0x91   :  { %v63_v51 = vsel %vm59_vm4, %v58_v22, %v52_v20  ;;  %v61_v52 = vsel %vm59_vm4, %v54_v19, %v56_v23  ;;  %v60_v59 = vsel %vm59_vm4, %v56_v23, %v58_v22  ;;  %v147_v19 = vrot.slane %v580_v58, 2 }
  0x92   :  { %v160_v5 = vrot.slane %v63_v51, 7  ;;  %v158_v6 = vrot.slane %v61_v52, 7  ;;  %v159_v9 = vrot.slane %v60_v59, 7  ;;  %v224_v22 = vsel %vm223_vm6, %v145_v57, %v157_v63 }
  0x94   :  { %v529_v25 = vpop.permute.xlu1 %105  ;;  %v531_v26 = vpop.permute.xlu0 %103  ;;  %v225_v31 = vsel %vm223_vm6, %v146_v15, %v158_v6  ;;  %v226_v36 = vsel %vm223_vm6, %v147_v19, %v159_v9 }
  0x95   :  { %v114_v16 = vsel %vm111_vm5, %v531_v26, %v529_v25 }
  0x98   :  { %v110_v28 = vpop.permute.xlu1 %109  ;;  %v108_v29 = vpop.permute.xlu0 %107 }
  0x99   :  { %v113_v4 = vsel %vm111_vm5, %v529_v25, %v108_v29  ;;  %v115_v10 = vsel %vm111_vm5, %v110_v28, %v531_v26  ;;  %v112_v17 = vsel %vm111_vm5, %v108_v29, %v110_v28  ;;  %v205_v25 = vrot.slane %v114_v16, 3 }
  0x9a   :  { %v206_v18 = vrot.slane %v113_v4, 3  ;;  %v208_v23 = vrot.slane %v115_v10, 3  ;;  %v207_v26 = vrot.slane %v112_v17, 3  ;;  %v227_v29 = vsel %vm223_vm6, %v148_v61, %v160_v5 }
  0x9b   :  { %v244_v63 = vsel %vm243_vm10, %v565_v50, %v205_v25 }
  0x9c   :  { %v67_v40 = vpop.permute.xlu1 %66  ;;  %v65_v41 = vpop.permute.xlu0 %64  ;;  %v247_v52 = vsel %vm243_vm10, %v242_v56, %v208_v23  ;;  %v246_v4 = vsel %vm243_vm10, %v241_v60, %v207_v26 }
  0x9d   :  { %v75_v11 = vsel %vm72_vm7, %v65_v41, %v67_v40 }
  0x9e   :  { %v169_v27 = vrot.slane %v75_v11, 4 }
  0xa0   :  { %v71_v53 = vpop.permute.xlu1 %70  ;;  %v69_v54 = vpop.permute.xlu0 %68 }
  0xa1   :  { %v76_v7 = vsel %vm72_vm7, %v71_v53, %v65_v41  ;;  %v74_v8 = vsel %vm72_vm7, %v67_v40, %v69_v54  ;;  %v73_v12 = vsel %vm72_vm7, %v69_v54, %v71_v53  ;;  %v245_v41 = vsel %vm243_vm10, %v240_v55, %v206_v18 }
  0xa2   :  { %v172_v20 = vrot.slane %v76_v7, 4  ;;  %v170_v21 = vrot.slane %v74_v8, 4  ;;  %v171_v30 = vrot.slane %v73_v12, 4  ;;  %v229_v53 = vsel %vm228_vm11, %v224_v22, %v169_v27 }
  0xa3   :  { %v234_v50 = vsel %vm233_vm13, %v229_v53, %v181_v42 }
  0xa4   :  { %v119_v13 = vpop.permute.xlu1 %118  ;;  %v117_v14 = vpop.permute.xlu0 %116  ;;  %v230_v49 = vsel %vm228_vm11, %v225_v31, %v170_v21  ;;  %v232_v51 = vsel %vm228_vm11, %v227_v29, %v172_v20  ;;  %v231_v54 = vsel %vm228_vm11, %v226_v36, %v171_v30 }
  0xa5   :  { %v127_v43 = vsel %vm124_vm8, %v117_v14, %v119_v13  ;;  %v235_v56 = vsel %vm233_vm13, %v230_v49, %v182_v45  ;;  %v237_v6 = vsel %vm233_vm13, %v232_v51, %v184_v44  ;;  %v236_v60 = vsel %vm233_vm13, %v231_v54, %v183_v47 }
  0xa8   :  { %v123_v33 = vpop.permute.xlu1 %122  ;;  %v121_v28 = vpop.permute.xlu0 %120 }
  0xa9   :  { %v126_v38 = vsel %vm124_vm8, %v119_v13, %v121_v28  ;;  %v128_v39 = vsel %vm124_vm8, %v123_v33, %v117_v14  ;;  %v125_v40 = vsel %vm124_vm8, %v121_v28, %v123_v33 }
  0xaa   :  { %423 = vmatprep.subr.msk.mxu0 %vm213_vm9, %v126_v38  ;;  %426 = vmatprep.subr.msk.mxu1 %vm213_vm9, %v128_v39 }
  0xab   :  { %424 = vmatpush1.msk.msra.mxu0 %vm213_vm9, %v127_v43  ;;  %427 = vmatpush1.msk.msra.mxu1 %vm213_vm9, %v125_v40 }
  0xac   :  { %v26_v55 = vpop.permute.xlu1 %25  ;;  %297 = vmatprep.subr.mxu0 %v245_v41  ;;  %368 = vmatprep.subr.mxu1 %v247_v52  ;;  %v24_v59 = vpop.permute.xlu0 %23 }
  0xad   :  { %v36_v5 = vsel %vm33_vm12, %v24_v59, %v26_v55  ;;  %298 = vmatpush1.msra.mxu0 %v244_v63  ;;  %369 = vmatpush1.msra.mxu1 %v246_v4 }
  0xae   :  { %299 = vmatprep.subr.mxu0 %v235_v56  ;;  %370 = vmatprep.subr.mxu1 %v237_v6  ;;  %v133_v7 = vrot.slane %v36_v5, 5 }
  0xaf   :  { %300 = vmatpush1.msra.mxu0 %v234_v50  ;;  %371 = vmatpush1.msra.mxu1 %v236_v60 }
  0xb0   :  { %v30_v35 = vpop.permute.xlu1 %29  ;;  %v28_v8 = vpop.permute.xlu0 %27  ;;  %v214_v37 = vsel %vm213_vm9, %v482_v1, %v133_v7  ;;  %v248_v1 = vld [vmem:[%s701_s1] sm:$0x3f] }
  0xb1   :  { %v37_v34 = vsel %vm33_vm12, %v30_v35, %v24_v59  ;;  %v34_v44 = vsel %vm33_vm12, %v28_v8, %v30_v35  ;;  %v35_v32 = vsel %vm33_vm12, %v26_v55, %v28_v8 }
  0xb2   :  { %v136_v45 = vrot.slane %v37_v34, 5  ;;  %v134_v42 = vrot.slane %v35_v32, 5  ;;  %v135_v9 = vrot.slane %v34_v44, 5 }
  0xb4   :  { %v215_v47 = vsel %vm213_vm9, %v492_v3, %v134_v42  ;;  %v217_v10 = vsel %vm213_vm9, %v488_v2, %v136_v45  ;;  %v216_v11 = vsel %vm213_vm9, %v477_v0, %v135_v9  ;;  %v219_v2 = vsel %vm218_vm14, %v214_v37, %v145_v57 }
  0xb5   :  { %v220_v24 = vsel %vm218_vm14, %v215_v47, %v146_v15  ;;  %v222_v12 = vsel %vm218_vm14, %v217_v10, %v148_v61  ;;  %v221_v13 = vsel %vm218_vm14, %v216_v11, %v147_v19 }
  0xb6   :  { %301 = vmatprep.subr.mxu0 %v220_v24  ;;  %372 = vmatprep.subr.mxu1 %v222_v12 }
  0xb7   :  { %302 = vmatpush1.msra.mxu0 %v219_v2  ;;  %373 = vmatpush1.msra.mxu1 %v221_v13 }
  0xb8   :  { %425 = vmatmul.mubr.msk.f32.vlgmr.msra.gmra.mxu0 %vm255_vm15, %v248_v1  ;;  %428 = vmatmul.mubr.msk.f32.vlgmr.msra.gmra.mxu1 %vm255_vm15, %v248_v1 }
  0xbd   :  { %v253_v0 = vpop.permute.xlu0 %252 }
 0x178   :  { %v337_v3 = vpop.f32.mrf.mxu0  ;;  %v408_v48 = vpop.f32.mrf.mxu1 }
 0x179   :  { %v338_v61 = vadd.f32 %v337_v3, %v253_v0  ;;  %v409_v58 = vadd.f32 %v408_v48, %v253_v0 }
 0x17a   :  { %v339_v62 = vpop.f32.mrf.mxu0  ;;  %v410_v14 = vpop.f32.mrf.mxu1 }
 0x17b   :  { %413 = vst [vmem:[%s702_s3] sm:$0x3f] %v338_v61  ;;  %429 = vst [vmem:[%s702_s3 + $0x10] sm:$0x3f] %v409_v58  ;;  %v340_v46 = vadd.f32 %v339_v62, %v253_v0  ;;  %v411_v57 = vadd.f32 %v410_v14, %v253_v0 }
 0x17d   :  { %414 = vst [vmem:[%s702_s3 + $0x8] sm:$0x3f] %v340_v46  ;;  %430 = vst [vmem:[%s702_s3 + $0x18] sm:$0x3f] %v411_v57 }

</bundles_post_ra>
